<compile_context>
chip_gen: v7x
topology: tpu7x:2x2x1
jax: 0.10.0
libtpu: 0.0.40
codegen_flags: <defaults>
</compile_context>

<pallas_src>
import functools
import math

import jax
import jax.numpy as jnp
from jax import lax
from jax.experimental import pallas as pl
from jax.experimental.pallas import tpu as pltpu


N_BIAS_ROWS = 8  # b1, b2, bhead, std_row, logp_row (+3 rows of padding to a sublane tile)


def _round_up(x, m):
    return ((x + m - 1) // m) * m


# ---------------------------------------------------------------------------
# Pallas kernel: one batch tile, full fused act() compute.
# ---------------------------------------------------------------------------
def _policy_act_kernel(x_ref, eps_ref, p_ref, out_ref, *, din, lw, num_outputs):
    A = num_outputs

    # Static slices of the single parameter slab (all offsets sublane-aligned).
    w1 = p_ref[0:din, :]                      # (din, LW)  [wc1 | wa1 | 0]
    w2 = p_ref[din:din + lw, :]               # (LW, LW)   block-diag(wc2, wa2)
    wh = p_ref[din + lw:din + 2 * lw, :]      # (LW, LW)   mean cols 0..A-1, value col A
    rows = p_ref[din + 2 * lw:din + 2 * lw + N_BIAS_ROWS, :]   # (8, LW)
    b1 = rows[0:1, :]
    b2 = rows[1:2, :]
    bh = rows[2:3, :]
    std_row = rows[3:4, :]                    # exp(logstd) on lanes 0..A-1, 0 elsewhere
    logp_row = rows[4:5, :]                   # -(logstd + 0.5*log(2*pi)) on lanes 0..A-1

    x = x_ref[...]                            # (TB, din)
    eps = eps_ref[...]                        # (TB, LW), zero beyond lane A-1

    # Fused critic|actor MLP: three lane-dense matmuls.
    h1 = jnp.tanh(jnp.dot(x, w1, preferred_element_type=jnp.float32) + b1)
    h2 = jnp.tanh(jnp.dot(h1, w2, preferred_element_type=jnp.float32) + b2)
    head = jnp.dot(h2, wh, preferred_element_type=jnp.float32) + bh   # mean | value | 0

    # Reparameterized sample: action = mean + std*eps. std/eps padding is zero, so the
    # value column (lane A) and pad lanes pass through untouched.
    out = head + std_row * eps

    # log_prob: action - mean == std*eps exactly here, so the Normal log_prob per lane
    # is -0.5*eps^2 - logstd - 0.5*log(2*pi); pad lanes contribute exactly 0.
    logp = jnp.sum(-0.5 * eps * eps + logp_row, axis=-1, keepdims=True)   # (TB, 1)

    lane = lax.broadcasted_iota(jnp.int32, out.shape, 1)
    out_ref[...] = jnp.where(lane == A + 1, logp, out)


# ---------------------------------------------------------------------------
# Host-side parameter packing: one contiguous (rows, LW) f32 slab.
# ---------------------------------------------------------------------------
def pack_params(p, input_d, hidden, num_outputs):
    H, A = hidden, num_outputs
    H2 = 2 * H
    LW = max(128, _round_up(H2, 128))          # lane width of the slab / outputs
    din_p = _round_up(input_d, 8)
    assert A + 2 <= LW, "action dim + value + logp must fit in the output slab"

    w1 = jnp.zeros((din_p, LW), jnp.float32)
    w1 = w1.at[:input_d, :H].set(p["wc1"]).at[:input_d, H:H2].set(p["wa1"])

    w2 = jnp.zeros((LW, LW), jnp.float32)
    w2 = w2.at[:H, :H].set(p["wc2"]).at[H:H2, H:H2].set(p["wa2"])

    wh = jnp.zeros((LW, LW), jnp.float32)
    wh = wh.at[H:H2, :A].set(p["wm"]).at[:H, A].set(p["wcl"][:, 0])

    logstd = p["logstd"][0]
    rows = jnp.zeros((N_BIAS_ROWS, LW), jnp.float32)
    rows = rows.at[0, :H].set(p["bc1"][0]).at[0, H:H2].set(p["ba1"][0])
    rows = rows.at[1, :H].set(p["bc2"][0]).at[1, H:H2].set(p["ba2"][0])
    rows = rows.at[2, :A].set(p["bm"][0]).at[2, A].set(p["bcl"][0, 0])
    rows = rows.at[3, :A].set(jnp.exp(logstd))
    rows = rows.at[4, :A].set(-(logstd + 0.5 * math.log(2.0 * math.pi)))

    slab = jnp.concatenate([w1, w2, wh, rows], axis=0)
    return slab, din_p, LW


# ---------------------------------------------------------------------------
# Wrapper: batch-tiled pallas_call with resident weights.
# ---------------------------------------------------------------------------
def policy_act(x, eps, params, *, hidden=64, batch_tile=256):
    B, input_d = x.shape
    A = eps.shape[1]
    slab, din_p, LW = pack_params(params, input_d, hidden, A)

    TB = min(batch_tile, _round_up(B, 8))      # batch tile (multiple of 8 sublanes)
    B_pad = _round_up(B, TB)

    x_p = jnp.zeros((B_pad, din_p), jnp.float32).at[:B, :input_d].set(x)
    eps_p = jnp.zeros((B_pad, LW), jnp.float32).at[:B, :A].set(eps)

    kernel = functools.partial(
        _policy_act_kernel, din=din_p, lw=LW, num_outputs=A)

    out = pl.pallas_call(
        kernel,
        out_shape=jax.ShapeDtypeStruct((B_pad, LW), jnp.float32),
        grid=(B_pad // TB,),
        in_specs=[
            pl.BlockSpec((TB, din_p), lambda i: (i, 0)),
            pl.BlockSpec((TB, LW), lambda i: (i, 0)),
            pl.BlockSpec(slab.shape, lambda i: (0, 0)),   # params resident across tiles
        ],
        out_specs=pl.BlockSpec((TB, LW), lambda i: (i, 0)),
        compiler_params=pltpu.CompilerParams(
            dimension_semantics=("parallel",),            # shards tiles across TCs (v7x)
            vmem_limit_bytes=32 << 20,                    # budget ceiling valid on v7x too
        ),
    )(x_p, eps_p, slab)

    value = out[:B, A:A + 1]
    action = out[:B, :A]
    logp = out[:B, A + 1:A + 2]
    return value, action, logp


# ---------------------------------------------------------------------------
# Deterministic parameter init (orthogonal weights, zero biases), plain JAX.
# ---------------------------------------------------------------------------
def orthogonal_init(key, in_dim, out_dim, gain):
    a = jax.random.normal(key, (max(in_dim, out_dim), min(in_dim, out_dim)),
                          dtype=jnp.float32)
    q, r = jnp.linalg.qr(a)
    q = q * jnp.sign(jnp.diagonal(r))
    if in_dim < out_dim:
        q = q.T
    return (gain * q[:in_dim, :out_dim]).astype(jnp.float32)


def make_params(key, input_d, hidden, num_outputs):
    ks = jax.random.split(key, 8)
    g = math.sqrt(2.0)
    return {
        # critic
        "wc1": orthogonal_init(ks[0], input_d, hidden, g),
        "bc1": jnp.zeros((1, hidden), jnp.float32),
        "wc2": orthogonal_init(ks[1], hidden, hidden, g),
        "bc2": jnp.zeros((1, hidden), jnp.float32),
        "wcl": orthogonal_init(ks[2], hidden, 1, g),
        "bcl": jnp.zeros((1, 1), jnp.float32),
        # actor
        "wa1": orthogonal_init(ks[3], input_d, hidden, g),
        "ba1": jnp.zeros((1, hidden), jnp.float32),
        "wa2": orthogonal_init(ks[4], hidden, hidden, g),
        "ba2": jnp.zeros((1, hidden), jnp.float32),
        # DiagGaussian head
        "wm": orthogonal_init(ks[5], hidden, num_outputs, 1.0),
        "bm": jnp.zeros((1, num_outputs), jnp.float32),
        # AddBias logstd (initialized to zeros, applied to a zeros tensor)
        "logstd": jnp.zeros((1, num_outputs), jnp.float32),
    }


# Pure-JAX reference (unfused) for a sanity check.
def policy_act_ref(x, eps, p):
    hc = jnp.tanh(x @ p["wc1"] + p["bc1"])
    hc = jnp.tanh(hc @ p["wc2"] + p["bc2"])
    value = hc @ p["wcl"] + p["bcl"]
    ha = jnp.tanh(x @ p["wa1"] + p["ba1"])
    ha = jnp.tanh(ha @ p["wa2"] + p["ba2"])
    mean = ha @ p["wm"] + p["bm"]
    std = jnp.exp(p["logstd"])
    action = mean + std * eps
    logp = (-((action - mean) ** 2) / (2 * std * std)
            - p["logstd"] - 0.5 * math.log(2 * math.pi))
    return value, action, jnp.sum(logp, axis=-1, keepdims=True)


if __name__ == "__main__":
    B, INPUT_D, HIDDEN, NUM_OUTPUTS = 8, 32, 64, 8

    key = jax.random.PRNGKey(0)
    k_x, k_eps, k_p = jax.random.split(key, 3)
    x = jax.random.normal(k_x, (B, INPUT_D), dtype=jnp.float32)
    # Pre-drawn standard-normal noise for dist.sample() (reparameterized).
    eps = jax.random.normal(k_eps, (B, NUM_OUTPUTS), dtype=jnp.float32)
    params = make_params(k_p, INPUT_D, HIDDEN, NUM_OUTPUTS)

    value, action, logp = policy_act(x, eps, params, hidden=HIDDEN)
    jax.block_until_ready((value, action, logp))

    v_ref, a_ref, lp_ref = policy_act_ref(x, eps, params)
    assert value.shape == (B, 1) and action.shape == (B, NUM_OUTPUTS) and logp.shape == (B, 1)
    assert jnp.allclose(value, v_ref, atol=1e-4)
    assert jnp.allclose(action, a_ref, atol=1e-4)
    assert jnp.allclose(logp, lp_ref, atol=1e-4)

    # TODO(synk): dist_entropy mean is computed in Policy.act but never returned; omitted.
    print("KERNEL_OK")
</pallas_src>

<mosaic_0001>
module attributes {stable_mosaic.version = 11 : i64} {
  func.func @_policy_act_kernel(%arg0: i32, %arg1: memref<8x32xf32, #tpu.memory_space<vmem>>, %arg2: memref<8x128xf32, #tpu.memory_space<vmem>>, %arg3: memref<296x128xf32, #tpu.memory_space<vmem>>, %arg4: memref<8x128xf32, #tpu.memory_space<vmem>>) attributes {dimension_semantics = [#tpu.dimension_semantics<parallel>], iteration_bounds = array<i64: 1>, scalar_prefetch = 0 : i64, scratch_operands = 0 : i64, tpu.core_type = #tpu.core_type<tc>, window_params = [{transform_indices = @transform_0, window_bounds = array<i64: 8, 32>}, {transform_indices = @transform_1, window_bounds = array<i64: 8, 128>}, {pipeline_mode = #tpu.pipeline_mode<synchronous>, transform_indices = @transform_2, window_bounds = array<i64: 296, 128>}, {transform_indices = @transform_3, window_bounds = array<i64: 8, 128>}]} {
    %c0 = arith.constant 0 : index
    %c0_0 = arith.constant 0 : index
    %0 = vector.load %arg3[%c0, %c0_0] : memref<296x128xf32, #tpu.memory_space<vmem>>, vector<32x128xf32>
    %c32 = arith.constant 32 : index
    %c0_1 = arith.constant 0 : index
    %1 = vector.load %arg3[%c32, %c0_1] : memref<296x128xf32, #tpu.memory_space<vmem>>, vector<128x128xf32>
    %c160 = arith.constant 160 : index
    %c0_2 = arith.constant 0 : index
    %2 = vector.load %arg3[%c160, %c0_2] : memref<296x128xf32, #tpu.memory_space<vmem>>, vector<128x128xf32>
    %c288 = arith.constant 288 : index
    %c0_3 = arith.constant 0 : index
    %3 = vector.load %arg3[%c288, %c0_3] : memref<296x128xf32, #tpu.memory_space<vmem>>, vector<8x128xf32>
    %4 = vector.extract_strided_slice %3 {offsets = [0, 0], sizes = [1, 128], strides = [1, 1]} : vector<8x128xf32> to vector<1x128xf32>
    %5 = vector.extract_strided_slice %3 {offsets = [1, 0], sizes = [1, 128], strides = [1, 1]} : vector<8x128xf32> to vector<1x128xf32>
    %6 = vector.extract_strided_slice %3 {offsets = [2, 0], sizes = [1, 128], strides = [1, 1]} : vector<8x128xf32> to vector<1x128xf32>
    %7 = vector.extract_strided_slice %3 {offsets = [3, 0], sizes = [1, 128], strides = [1, 1]} : vector<8x128xf32> to vector<1x128xf32>
    %8 = vector.extract_strided_slice %3 {offsets = [4, 0], sizes = [1, 128], strides = [1, 1]} : vector<8x128xf32> to vector<1x128xf32>
    %c0_4 = arith.constant 0 : index
    %c0_5 = arith.constant 0 : index
    %9 = vector.load %arg1[%c0_4, %c0_5] : memref<8x32xf32, #tpu.memory_space<vmem>>, vector<8x32xf32>
    %c0_6 = arith.constant 0 : index
    %c0_7 = arith.constant 0 : index
    %10 = vector.load %arg2[%c0_6, %c0_7] : memref<8x128xf32, #tpu.memory_space<vmem>>, vector<8x128xf32>
    %cst = arith.constant dense<0.000000e+00> : vector<8x128xf32>
    %11 = tpu.matmul %9, %0, %cst {dimension_numbers = #tpu.dot_dimension_numbers<[1], [0], [0], [1], [0, 0, 1, 1], [], []>} : vector<8x32xf32>, vector<32x128xf32>, vector<8x128xf32> -> vector<8x128xf32>
    %12 = vector.broadcast %4 : vector<1x128xf32> to vector<8x128xf32>
    %13 = arith.addf %11, %12 : vector<8x128xf32>
    %14 = math.tanh %13 : vector<8x128xf32>
    %cst_8 = arith.constant dense<0.000000e+00> : vector<8x128xf32>
    %15 = tpu.matmul %14, %1, %cst_8 {dimension_numbers = #tpu.dot_dimension_numbers<[1], [0], [0], [1], [0, 0, 1, 1], [], []>} : vector<8x128xf32>, vector<128x128xf32>, vector<8x128xf32> -> vector<8x128xf32>
    %16 = vector.broadcast %5 : vector<1x128xf32> to vector<8x128xf32>
    %17 = arith.addf %15, %16 : vector<8x128xf32>
    %18 = math.tanh %17 : vector<8x128xf32>
    %cst_9 = arith.constant dense<0.000000e+00> : vector<8x128xf32>
    %19 = tpu.matmul %18, %2, %cst_9 {dimension_numbers = #tpu.dot_dimension_numbers<[1], [0], [0], [1], [0, 0, 1, 1], [], []>} : vector<8x128xf32>, vector<128x128xf32>, vector<8x128xf32> -> vector<8x128xf32>
    %20 = vector.broadcast %6 : vector<1x128xf32> to vector<8x128xf32>
    %21 = arith.addf %19, %20 : vector<8x128xf32>
    %22 = vector.broadcast %7 : vector<1x128xf32> to vector<8x128xf32>
    %23 = arith.mulf %22, %10 : vector<8x128xf32>
    %24 = arith.addf %21, %23 : vector<8x128xf32>
    %cst_10 = arith.constant -5.000000e-01 : f32
    %25 = vector.broadcast %cst_10 : f32 to vector<8x128xf32>
    %26 = arith.mulf %25, %10 : vector<8x128xf32>
    %27 = arith.mulf %26, %10 : vector<8x128xf32>
    %28 = vector.broadcast %8 : vector<1x128xf32> to vector<8x128xf32>
    %29 = arith.addf %27, %28 : vector<8x128xf32>
    %cst_11 = arith.constant dense<0.000000e+00> : vector<8xf32>
    %30 = vector.multi_reduction <add>, %29, %cst_11 [1] : vector<8x128xf32> to vector<8xf32>
    %31 = vector.shape_cast %30 : vector<8xf32> to vector<8x1xf32>
    %32 = tpu.iota {dimensions = array<i32: 1>} : vector<8x128xi32>
    %c9_i32 = arith.constant 9 : i32
    %33 = vector.broadcast %c9_i32 : i32 to vector<8x128xi32>
    %34 = arith.cmpi eq, %32, %33 : vector<8x128xi32>
    %35 = vector.shape_cast %31 : vector<8x1xf32> to vector<8x1xf32>
    %36 = vector.broadcast %35 : vector<8x1xf32> to vector<8x128xf32>
    %37 = arith.select %34, %36, %24 : vector<8x128xi1>, vector<8x128xf32>
    %c0_12 = arith.constant 0 : index
    %c0_13 = arith.constant 0 : index
    %38 = vector.load %arg4[%c0_12, %c0_13] : memref<8x128xf32, #tpu.memory_space<vmem>>, vector<8x128xf32>
    tpu.vector_store %arg4[%c0_12, %c0_13], %37 {strides = array<i32>} : memref<8x128xf32, #tpu.memory_space<vmem>>, vector<8x128xf32>,
    return
  }
  func.func @transform_0(%arg0: i32) -> (i32, i32) {
    %c0_i32 = arith.constant 0 : i32
    %c0_i32_0 = arith.constant 0 : i32
    return %arg0, %c0_i32 : i32, i32
  }
  func.func @transform_1(%arg0: i32) -> (i32, i32) {
    %c0_i32 = arith.constant 0 : i32
    %c0_i32_0 = arith.constant 0 : i32
    return %arg0, %c0_i32 : i32, i32
  }
  func.func @transform_2(%arg0: i32) -> (i32, i32) {
    %c0_i32 = arith.constant 0 : i32
    %c0_i32_0 = arith.constant 0 : i32
    %c0_i32_1 = arith.constant 0 : i32
    return %c0_i32, %c0_i32_0 : i32, i32
  }
  func.func @transform_3(%arg0: i32) -> (i32, i32) {
    %c0_i32 = arith.constant 0 : i32
    %c0_i32_0 = arith.constant 0 : i32
    return %arg0, %c0_i32 : i32, i32
  }
}

</mosaic_0001>

<bundles_post_ra>
// kernel: tpu_custom_call.1
= control target key start
LH: loop header
LB: loop body
LE: loop exit
PB: predicated region body
PF: predicated region fallthrough
CT: control target
= control target key end

     0   :  { %8 = vsyncpa [#allocation3], 0  ;;  %s735_s0 = inlined_call_operand.hbm [shape: f32[8,32], index: 0, kind: input, shape index: {}]   ;;  %s736_s1 = inlined_call_operand.hbm [shape: f32[8,128], index: 1, kind: input, shape index: {}]   ;;  %s737_s2 = inlined_call_operand.hbm [shape: f32[296,128], index: 2, kind: input, shape index: {}]   ;;  %s738_s3 = inlined_call_operand.hbm [shape: f32[8,128], index: 3, kind: output, shape index: {}]  }
   0x1   :  { %9 = vsyncpa [#allocation6], 0 }
   0x2   :  { %10 = vsyncpa [#allocation4], 0  ;;  %s637_s12 = smov [#allocation5]   ;;  %s638_s14 = smov [#allocation2]  }
   0x3   :  { %s27_s13 = sshll.u32 %s637_s12, 4  ;;  %s17_s15 = sshll.u32 %s638_s14, 4  ;;  %s28_s13 = int_to_ptr.vmem [resolvable:$true] %s27_s13  ;;  %s18_s15 = int_to_ptr.vmem [resolvable:$true] %s17_s15 }
   0x4   :  { %s543_s18 = scalar_lea.hbm %s736_s1, 128 }
   0x5   :  { %p544_p0 = scmp.ne.s32.totalorder %s736_s1, %s543_s18  ;;  %p547_p1 = scmp.lt.u32.totalorder %s543_s18, %s736_s1 }
   0x7   :  { %p549_p2 = pnand %p547_p1, %p544_p0 }
   0x9   :  { %552 = shalt.err (!%p549_p2)
}
   0xa   :  { %s553_s23 = scalar_lea.vmem %s28_s13, 128  ;;  %p558_p4 = scmp.lt.s32.totalorder %s28_s13, %s28_s13 }
   0xb   :  { %p554_p3 = scmp.ne.s32.totalorder %s28_s13, %s553_s23  ;;  %p559_p5 = scmp.lt.s32.totalorder %s553_s23, %s553_s23 }
   0xd   :  { %p560_p6 = por %p559_p5, %p558_p4 }
   0xf   :  { %p561_p7 = pnand %p560_p6, %p554_p3 }
  0x11   :  { %564 = shalt.err (!%p561_p7)
}
  0x12   :  { %30 = dma.hbm_to_vmem [thread:$0]  %s736_s1, 128, %s28_s13, [#allocation6]  }
  0x13   :  { %s565_s28 = scalar_lea.hbm %s735_s0, 128 }
  0x14   :  { %p566_p8 = scmp.ne.s32.totalorder %s735_s0, %s565_s28  ;;  %p569_p9 = scmp.lt.u32.totalorder %s565_s28, %s735_s0 }
  0x16   :  { %p571_p10 = pnand %p569_p9, %p566_p8 }
  0x18   :  { %574 = shalt.err (!%p571_p10)
}
  0x19   :  { %s575_s6 = scalar_lea.vmem %s18_s15, 128  ;;  %p580_p12 = scmp.lt.s32.totalorder %s18_s15, %s18_s15 }
  0x1a   :  { %p576_p11 = scmp.ne.s32.totalorder %s18_s15, %s575_s6  ;;  %p581_p13 = scmp.lt.s32.totalorder %s575_s6, %s575_s6 }
  0x1c   :  { %p582_p0 = por %p581_p13, %p580_p12 }
  0x1e   :  { %p583_p1 = pnand %p582_p0, %p576_p11 }
  0x20   :  { %586 = shalt.err (!%p583_p1)
}
  0x21   :  { %20 = dma.hbm_to_vmem [thread:$0]  %s735_s0, 128, %s18_s15, [#allocation3]  }
  0x22   :  { %s639_s8 = smov [#allocation7]   ;;  %s587_s12 = scalar_lea.hbm %s737_s2, 4736 }
  0x23   :  { %s36_s9 = sshll.u32 %s639_s8, 4  ;;  %p588_p2 = scmp.ne.s32.totalorder %s737_s2, %s587_s12  ;;  %s37_s9 = int_to_ptr.vmem [resolvable:$true] %s36_s9 }
  0x24   :  { %p591_p3 = scmp.lt.u32.totalorder %s587_s12, %s737_s2 }
  0x26   :  { %p593_p4 = pnand %p591_p3, %p588_p2 }
  0x28   :  { %596 = shalt.err (!%p593_p4)
}
  0x29   :  { %s597_s18 = scalar_lea.vmem %s37_s9, 4736  ;;  %p602_p6 = scmp.lt.s32.totalorder %s37_s9, %s37_s9 }
  0x2a   :  { %p598_p5 = scmp.ne.s32.totalorder %s37_s9, %s597_s18  ;;  %p603_p7 = scmp.lt.s32.totalorder %s597_s18, %s597_s18 }
  0x2c   :  { %p604_p8 = por %p603_p7, %p602_p6 }
  0x2e   :  { %p605_p9 = pnand %p604_p8, %p598_p5 }
  0x30   :  { %608 = shalt.err (!%p605_p9)
}
  0x31   :  { %s640_s0 = smov 128   ;;  %s641_s15 = smov 8  }
  0x32   :  { %42 = dma.hbm_to_vmem [thread:$0]  %s737_s2, 4736, %s37_s9, [#allocation6], %s640_s0, %s640_s0, %s641_s15  }
  0x33   :  { %631 = dma.done.wait [#allocation3], 128  }
  0x34   :  { %632 = vsyncadd [#allocation3], 4294967168 }
  0x35   :  { %633 = dma.done.wait [#allocation6], 4864  }
  0x36   :  { %634 = vsyncadd [#allocation6], 4294962432  ;;  %v642_v0 = vmov 0.0|0.0   ;;  %vm643_vm0 = vmmov 0   ;;  %v644_v1 = vmov 0.0   ;;  %v52_v2 = vld [vmem:[#allocation7] sm:$0xff]  ;;  %v91_v48 = vlaneseq }
  0x37   :  { %476 = vmatprep.subr.bf16.mxu0 %v642_v0  ;;  %403 = vmatprep.mubr.msk.f32.mxu0 %vm643_vm0, %v644_v1  ;;  %v53_v3 = vld [vmem:[#allocation7 + $0x8] sm:$0xff]  ;;  %v54_v4 = vld [vmem:[#allocation7 + $0x10] sm:$0xff]  ;;  %v55_v6 = vld [vmem:[#allocation7 + $0x18] sm:$0xff]  ;;  %vm95_vm1 = vcmask 261120   ;;  %s645_s2 = smov [#allocation8]  }
  0x38   :  { %482 = vmatprep.subr.bf16.mxu1 %v642_v0  ;;  %438 = vmatprep.mubr.msk.f32.mxu1 %vm643_vm0, %v644_v1  ;;  %v477_v5 = vpack.c.bf16 %v53_v3, %v52_v2  ;;  %v56_v7 = vld [vmem:[#allocation7 + $0x20] sm:$0xff]  ;;  %v57_v8 = vld [vmem:[#allocation7 + $0x28] sm:$0xff]  ;;  %v58_v9 = vld [vmem:[#allocation7 + $0x30] sm:$0xff]  ;;  %v480_v11 = vpack.c.bf16 %v55_v6, %v54_v4  ;;  %v92_v49 = vshrl.u32 %v91_v48, 7  ;;  %s345_s21 = sshll.u32 %s645_s2, 4  ;;  %s346_s21 = int_to_ptr.vmem [resolvable:$true] %s345_s21 }
  0x39   :  { %v59_v10 = vld [vmem:[#allocation7 + $0x38] sm:$0xff]  ;;  %v483_v12 = vpack.c.bf16 %v57_v8, %v56_v7  ;;  %v60_v14 = vld [vmem:[#allocation7 + $0x40] sm:$0xff]  ;;  %v61_v15 = vld [vmem:[#allocation7 + $0x48] sm:$0xff]  ;;  %s609_s22 = scalar_lea.vmem %s346_s21, 128  ;;  %p614_p11 = scmp.lt.s32.totalorder %s346_s21, %s346_s21 }
  0x3a   :  { %478 = vmatpush3.bf16.msra.mxu0 %v477_v5  ;;  %v486_v13 = vpack.c.bf16 %v59_v10, %v58_v9  ;;  %v89_v16 = vld [vmem:[#allocation2] sm:$0xff]  ;;  %v489_v17 = vpack.c.bf16 %v61_v15, %v60_v14  ;;  %v63_v19 = vld [vmem:[#allocation7 + $0x58] sm:$0xff]  ;;  %v64_v21 = vld [vmem:[#allocation7 + $0x60] sm:$0xff]  ;;  %v93_v50 = vsub.s32 0, %v92_v49  ;;  %v329_v4 = vsub.s32 4, %v92_v49  ;;  %p610_p10 = scmp.ne.s32.totalorder %s346_s21, %s609_s22  ;;  %p615_p12 = scmp.lt.s32.totalorder %s609_s22, %s609_s22 }
  0x3b   :  { %479 = vmatprep.subr.bf16.mxu0 %v642_v0  ;;  %484 = vmatpush3.bf16.msra.mxu1 %v483_v12  ;;  %v62_v18 = vld [vmem:[#allocation7 + $0x50] sm:$0xff]  ;;  %v65_v22 = vld [vmem:[#allocation7 + $0x68] sm:$0xff]  ;;  %v67_v25 = vld [vmem:[#allocation7 + $0x78] sm:$0xff]  ;;  %v172_v9 = vsub.s32 1, %v92_v49  ;;  %v321_v15 = vsub.s32 3, %v92_v49 }
  0x3c   :  { %485 = vmatprep.subr.bf16.mxu1 %v642_v0  ;;  %v492_v20 = vpack.c.bf16 %v63_v19, %v62_v18  ;;  %v495_v23 = vpack.c.bf16 %v65_v22, %v64_v21  ;;  %v66_v24 = vld [vmem:[#allocation7 + $0x70] sm:$0xff]  ;;  %v68_v27 = vld [vmem:[#allocation7 + $0x80] sm:$0xff]  ;;  %v69_v28 = vld [vmem:[#allocation7 + $0x88] sm:$0xff]  ;;  %v335_v18 = vand.u32 127, %v91_v48  ;;  %p616_p13 = por %p615_p12, %p614_p11 }
  0x3d   :  { %v498_v26 = vpack.c.bf16 %v67_v25, %v66_v24  ;;  %v501_v29 = vpack.c.bf16 %v69_v28, %v68_v27  ;;  %v70_v30 = vld [vmem:[#allocation7 + $0x90] sm:$0xff]  ;;  %v71_v31 = vld [vmem:[#allocation7 + $0x98] sm:$0xff]  ;;  %v72_v33 = vld [vmem:[#allocation7 + $0xa0] sm:$0xff] }
  0x3e   :  { %481 = vmatpush3.bf16.msra.mxu0 %v480_v11  ;;  %v504_v32 = vpack.c.bf16 %v71_v31, %v70_v30  ;;  %v73_v34 = vld [vmem:[#allocation7 + $0xa8] sm:$0xff]  ;;  %v74_v35 = vld [vmem:[#allocation7 + $0xb0] sm:$0xff]  ;;  %v75_v37 = vld [vmem:[#allocation7 + $0xb8] sm:$0xff]  ;;  %vm336_vm2 = vcmp.eq.s32.totalorder %v335_v18, 9  ;;  %p617_p0 = pnand %p616_p13, %p610_p10 }
  0x3f   :  { %506 = vmatprep.subr.bf16.mxu0 %v642_v0  ;;  %487 = vmatpush3.bf16.msra.mxu1 %v486_v13  ;;  %v507_v36 = vpack.c.bf16 %v73_v34, %v72_v33  ;;  %v510_v38 = vpack.c.bf16 %v75_v37, %v74_v35  ;;  %v76_v39 = vld [vmem:[#allocation7 + $0xc0] sm:$0xff]  ;;  %v77_v40 = vld [vmem:[#allocation7 + $0xc8] sm:$0xff]  ;;  %v78_v42 = vld [vmem:[#allocation7 + $0xd0] sm:$0xff] }
  0x40   :  { %488 = vmatprep.subr.bf16.mxu1 %v642_v0  ;;  %v513_v41 = vpack.c.bf16 %v77_v40, %v76_v39  ;;  %v79_v43 = vld [vmem:[#allocation7 + $0xd8] sm:$0xff]  ;;  %v80_v45 = vld [vmem:[#allocation7 + $0xe0] sm:$0xff]  ;;  %v81_v46 = vld [vmem:[#allocation7 + $0xe8] sm:$0xff] }
  0x41   :  { %404 = vmatmul.mubr.msk.f32.vlgmr.msra.gmra.mrb[0].mxu0 %vm95_vm1, %v89_v16  ;;  %v516_v44 = vpack.c.bf16 %v79_v43, %v78_v42  ;;  %v519_v47 = vpack.c.bf16 %v81_v46, %v80_v45  ;;  %v88_v51 = vld [vmem:[#allocation7 + $0x120] sm:$0xff]  ;;  %v82_v57 = vld [vmem:[#allocation7 + $0xf0] sm:$0xff]  ;;  %v83_v58 = vld [vmem:[#allocation7 + $0xf8] sm:$0xff]  ;;  %v247_v16 = vsub.s32 2, %v92_v49 }
  0x42   :  { %473 = vmatprep.mubr.msk.f32.mxu0 %vm643_vm0, %v644_v1  ;;  %508 = vmatpush3.bf16.msra.mxu0 %v507_v36  ;;  %v94_v52 = vrot.slane %v88_v51, %v93_v50  ;;  %v522_v59 = vpack.c.bf16 %v83_v58, %v82_v57  ;;  %v84_v60 = vld [vmem:[#allocation7 + $0x100] sm:$0xff]  ;;  %v85_v61 = vld [vmem:[#allocation7 + $0x108] sm:$0xff]  ;;  %v86_v63 = vld [vmem:[#allocation7 + $0x110] sm:$0xff]  ;;  %v330_v6 = vrot.slane %v88_v51, %v329_v4 }
  0x43   :  { %490 = vmatpush3.bf16.msra.mxu1 %v489_v17  ;;  %509 = vmatprep.subr.bf16.mxu0 %v642_v0  ;;  %v525_v62 = vpack.c.bf16 %v85_v61, %v84_v60  ;;  %v87_v1 = vld [vmem:[#allocation7 + $0x118] sm:$0xff]  ;;  %v173_v10 = vrot.slane %v88_v51, %v172_v9  ;;  %v322_v17 = vrot.slane %v88_v51, %v321_v15 }
  0x44   :  { %491 = vmatprep.subr.bf16.mxu1 %v642_v0  ;;  %v528_v2 = vpack.c.bf16 %v87_v1, %v86_v63  ;;  %v90_v3 = vld [vmem:[#allocation5] sm:$0xff] }
  0x45   :  { %v325_v5 = vmul.f32 -0.5, %v90_v3  ;;  %v323_v19 = vmul.f32 %v322_v17, %v90_v3 }
  0x46   :  { %511 = vmatpush3.bf16.msra.mxu0 %v510_v38 }
  0x47   :  { %493 = vmatpush3.bf16.msra.mxu1 %v492_v20  ;;  %512 = vmatprep.subr.bf16.mxu0 %v642_v0  ;;  %v326_v7 = vmul.f32 %v325_v5, %v90_v3 }
  0x48   :  { %494 = vmatprep.subr.bf16.mxu1 %v642_v0 }
  0x49   :  { %v331_v8 = vadd.f32 %v330_v6, %v326_v7 }
  0x4a   :  { %514 = vmatpush3.bf16.msra.mxu0 %v513_v41 }
  0x4b   :  { %496 = vmatpush3.bf16.msra.mxu1 %v495_v23  ;;  %515 = vmatprep.subr.bf16.mxu0 %v642_v0 }
  0x4c   :  { %497 = vmatprep.subr.bf16.mxu1 %v642_v0  ;;  %332 = vadd.xlane.f32.xlu0 %v331_v8 }
  0x4e   :  { %517 = vmatpush3.bf16.msra.mxu0 %v516_v44 }
  0x4f   :  { %499 = vmatpush3.bf16.msra.mxu1 %v498_v26  ;;  %518 = vmatprep.subr.bf16.mxu0 %v642_v0 }
  0x50   :  { %500 = vmatprep.subr.bf16.mxu1 %v642_v0 }
  0x52   :  { %520 = vmatpush3.bf16.msra.mxu0 %v519_v47 }
  0x53   :  { %502 = vmatpush3.bf16.msra.mxu1 %v501_v29  ;;  %521 = vmatprep.subr.bf16.mxu0 %v642_v0 }
  0x54   :  { %503 = vmatprep.subr.bf16.mxu1 %v642_v0 }
  0x56   :  { %523 = vmatpush3.bf16.msra.mxu0 %v522_v59 }
  0x57   :  { %505 = vmatpush3.bf16.msra.mxu1 %v504_v32  ;;  %524 = vmatprep.subr.bf16.mxu0 %v642_v0 }
  0x5a   :  { %526 = vmatpush3.bf16.msra.mxu0 %v525_v62 }
  0x5b   :  { %527 = vmatprep.subr.bf16.mxu0 %v642_v0  ;;  %v248_v0 = vrot.slane %v88_v51, %v247_v16 }
  0x5e   :  { %529 = vmatpush3.bf16.msra.mxu0 %v528_v2 }
  0xd9   :  { %v333_v23 = vpop.xlane.xlu0 %332 }
 0x114   :  { %v165_v53 = vpop.f32.mrb[0].mxu0 }
 0x115   :  { %v166_v54 = vadd.f32 %v165_v53, %v94_v52  ;;  %v405_v55 = vpop.f32.mrb[1].mxu0 }
 0x117   :  { %539 = vtanh.f32 %v166_v54 }
 0x121   :  { %v540_v56 = vpop.eup %539 }
 0x122   :  { %439 = vmatmul.mubr.f32.vlgmr.msra.gmra.mrb[0].mxu1 %v540_v56 }
 0x1f5   :  { %v240_v11 = vpop.f32.mrb[0].mxu1 }
 0x1f6   :  { %v241_v12 = vadd.f32 %v240_v11, %v173_v10  ;;  %v440_v13 = vpop.f32.mrb[1].mxu1 }
 0x1f8   :  { %541 = vtanh.f32 %v241_v12 }
 0x202   :  { %v542_v14 = vpop.eup %541 }
 0x203   :  { %474 = vmatmul.mubr.f32.vlgmr.msra.gmra.mrb[2].mxu0 %v542_v14 }
 0x2d6   :  { %v315_v20 = vpop.f32.mrb[2].mxu0 }
 0x2d7   :  { %v316_v21 = vadd.f32 %v315_v20, %v248_v0  ;;  %v475_v22 = vpop.f32.mrb[3].mxu0 }
 0x2d9   :  { %v324_v24 = vadd.f32 %v323_v19, %v316_v21 }
 0x2db   :  { %v337_v25 = vsel %vm336_vm2, %v333_v23, %v324_v24 }
 0x2dc   :  { %338 = vst [vmem:[#allocation8] sm:$0xff] %v337_v25 }
 0x2dd   :  { %620 = shalt.err (!%p617_p0)
}
 0x2de   :  { %s621_s25 = scalar_lea.hbm %s738_s3, 128 }
 0x2df   :  { %p622_p1 = scmp.ne.s32.totalorder %s738_s3, %s621_s25  ;;  %p625_p2 = scmp.lt.u32.totalorder %s621_s25, %s738_s3 }
 0x2e1   :  { %p627_p3 = pnand %p625_p2, %p622_p1 }
 0x2e3   :  { %630 = shalt.err (!%p627_p3)
}
 0x2e4   :  { %348 = dma.vmem_to_hbm [thread:$0]  %s346_s21, 128, %s738_s3, [#allocation4]  }
 0x2e5   :  { %635 = dma.done.wait [#allocation4], 128  }
 0x2e6   :  { %636 = vsyncadd [#allocation4], 4294967168 }
 0x2e7   :  { %352 = vsyncpa [#allocation3], 1 }
 0x2e8   :  { %353 = vsyncpa [#allocation6], 1 }
 0x2e9   :  { %354 = vsyncpa [#allocation4], 1 }

</bundles_post_ra>
